<compile_context>
chip_gen: v7x
topology: tpu7x:2x2x1
jax: 0.10.0
libtpu: 0.0.40
codegen_flags: <defaults>
</compile_context>

<pallas_src>
import functools

import jax
import jax.numpy as jnp
from jax.experimental import pallas as pl
from jax.experimental.pallas import tpu as pltpu

_LANE = 128      # TPU lane width; fused output dim padded to a multiple of this.
_SUBLANE = 8     # f32 sublane granularity for the batch (second-to-last) axis.


def _gp_fused_kernel(x_ref, w_ref, b_ref, out_ref):
    # Hot path: ONE matmul + bias add for both heads, all operands in VMEM,
    # f32 MXU accumulation.  out = x[tm, D_in] @ W[D_in, N_pad] + b[1, N_pad];
    # N_pad % 128 == 0 -> unmasked lane-dense stores.
    acc = jnp.dot(x_ref[...], w_ref[...], preferred_element_type=jnp.float32)
    out_ref[...] = (acc + b_ref[...].astype(jnp.float32)).astype(out_ref.dtype)


def prepare_gp_params(w_mean, b_mean, w_log_var, b_log_var, compute_dtype=None):
    """One-time parameter fusion (call OUTSIDE the jitted forward; module-state style).

    PyTorch layout: w_*: [D_out, D_in], b_*: [D_out].
    Returns (w_fused [D_in, N_pad], b_fused [1, N_pad], d_out): both heads concatenated
    along the output axis, transposed once, zero-padded to a multiple of 128 lanes.
    Pass compute_dtype=jnp.bfloat16 for HBM-bound scale (halves weight/input bytes).
    """
    d_out, _ = w_mean.shape
    n = 2 * d_out
    n_pad = ((n + _LANE - 1) // _LANE) * _LANE

    w_fused = jnp.concatenate([w_mean, w_log_var], axis=0).T       # [D_in, 2*D_out]
    b_fused = jnp.concatenate([b_mean, b_log_var], axis=0).reshape(1, n)

    if n_pad != n:
        # Zero-padded columns produce 0*x + 0 = 0 and are sliced off in the wrapper.
        w_fused = jnp.pad(w_fused, ((0, 0), (0, n_pad - n)))
        b_fused = jnp.pad(b_fused, ((0, 0), (0, n_pad - n)))
    if compute_dtype is not None:
        w_fused = w_fused.astype(compute_dtype)
    return w_fused, b_fused, d_out


def _vmem_capacity_bytes():
    # Trace-time hardware query; conservative fallback (v7x has 64 MiB per TC).
    try:
        return int(pltpu.get_tpu_info().vmem_capacity_bytes)
    except Exception:  # pragma: no cover - older jax / non-TPU tracing
        return 64 << 20


def _pick_batch_tile(batch, d_in, n_pad, itemsize):
    """Largest multiple-of-8 batch tile whose double-buffered x+out blocks fit ~1/3 VMEM."""
    budget = _vmem_capacity_bytes() // 3            # leave room for weights + scratch
    per_row = 2 * (d_in + n_pad) * itemsize         # double-buffered x row + out row
    max_rows = max(_SUBLANE, budget // max(per_row, 1))
    b8 = ((batch + _SUBLANE - 1) // _SUBLANE) * _SUBLANE
    tm = min(b8, 1024, (max_rows // _SUBLANE) * _SUBLANE)
    return max(tm, _SUBLANE)


@functools.partial(jax.jit, static_argnames=("d_out",))
def gaussian_process_forward(x, w_fused, b_fused, *, d_out):
    """x: [B, D_in]; w_fused: [D_in, N_pad]; b_fused: [1, N_pad].

    Returns (mean, log_var), each [B, d_out], matching the PyTorch module:
      mean = x @ w_mean.T + b_mean ; log_var = x @ w_log_var.T + b_log_var.
    """
    B, d_in = x.shape
    n_pad = w_fused.shape[1]
    itemsize = max(jnp.dtype(x.dtype).itemsize, jnp.dtype(w_fused.dtype).itemsize)

    # --- batch tiling -----------------------------------------------------------
    tm = _pick_batch_tile(B, d_in, n_pad, itemsize)
    b_pad = ((B + tm - 1) // tm) * tm
    if b_pad != B:
        x = jnp.pad(x, ((0, b_pad - B), (0, 0)))    # zero rows, sliced off below
    grid = (b_pad // tm,)

    # --- VMEM budget / compiler params -----------------------------------------
    resident = (d_in * n_pad + n_pad) * jnp.dtype(w_fused.dtype).itemsize
    tile_bytes = 2 * tm * (d_in + n_pad) * itemsize          # double-buffered x + out
    vmem_limit = int(min(0.75 * _vmem_capacity_bytes(),
                         max(32 << 20, 2 * (tile_bytes + resident))))

    cost = pl.CostEstimate(
        flops=2 * b_pad * n_pad * d_in,
        transcendentals=0,
        bytes_accessed=itemsize * (b_pad * d_in + d_in * n_pad + n_pad)
        + jnp.dtype(x.dtype).itemsize * b_pad * n_pad,
    )

    out = pl.pallas_call(
        _gp_fused_kernel,
        out_shape=jax.ShapeDtypeStruct((b_pad, n_pad), x.dtype),
        grid=grid,
        in_specs=[
            pl.BlockSpec((tm, d_in), lambda i: (i, 0)),       # x tile marches over batch
            pl.BlockSpec((d_in, n_pad), lambda i: (0, 0)),    # fused weight: VMEM-resident
            pl.BlockSpec((1, n_pad), lambda i: (0, 0)),       # fused bias:   VMEM-resident
        ],
        out_specs=pl.BlockSpec((tm, n_pad), lambda i: (i, 0)),
        compiler_params=pltpu.CompilerParams(
            dimension_semantics=("parallel",),                # dual-TC sharding on v7x
            vmem_limit_bytes=vmem_limit,
        ),
        cost_estimate=cost,
    )(x, w_fused, b_fused)

    # Zero-cost wrapper-side slices: drop batch padding, split the two heads.
    mean = out[:B, :d_out]
    log_var = out[:B, d_out:2 * d_out]
    return mean, log_var


if __name__ == "__main__":
    # Module hyperparameters (small, consistent with the forward pass).
    input_dim = 32
    output_dim = 16
    batch = 8

    key = jax.random.PRNGKey(0)
    kx, kwm, kbm, kwv, kbv = jax.random.split(key, 5)

    # Deterministic parameter init (PyTorch nn.Linear-style uniform bound).
    bound = 1.0 / (input_dim ** 0.5)
    x = jax.random.normal(kx, (batch, input_dim), dtype=jnp.float32)
    w_mean = jax.random.uniform(kwm, (output_dim, input_dim), jnp.float32, -bound, bound)
    b_mean = jax.random.uniform(kbm, (output_dim,), jnp.float32, -bound, bound)
    w_log_var = jax.random.uniform(kwv, (output_dim, input_dim), jnp.float32, -bound, bound)
    b_log_var = jax.random.uniform(kbv, (output_dim,), jnp.float32, -bound, bound)

    # One-time fusion (outside the jitted forward; would be module state in practice).
    # For HBM-bound scale pass compute_dtype=jnp.bfloat16 here; f32 kept for tight check.
    w_fused, b_fused, d_out = prepare_gp_params(w_mean, b_mean, w_log_var, b_log_var)
    w_fused, b_fused = jax.block_until_ready((w_fused, b_fused))

    mean, log_var = gaussian_process_forward(x, w_fused, b_fused, d_out=d_out)
    jax.block_until_ready((mean, log_var))

    # Reference check against plain JAX (same math as torch nn.Linear).
    ref_mean = x @ w_mean.T + b_mean
    ref_log_var = x @ w_log_var.T + b_log_var
    assert mean.shape == (batch, output_dim) and log_var.shape == (batch, output_dim)
    assert jnp.allclose(mean, ref_mean, atol=1e-5, rtol=1e-5)
    assert jnp.allclose(log_var, ref_log_var, atol=1e-5, rtol=1e-5)

    print("KERNEL_OK")
</pallas_src>

<mosaic_0001>
module attributes {stable_mosaic.version = 11 : i64} {
  func.func @_gp_fused_kernel(%arg0: i32, %arg1: memref<8x32xf32, #tpu.memory_space<vmem>>, %arg2: memref<32x128xf32, #tpu.memory_space<vmem>>, %arg3: memref<1x128xf32, #tpu.memory_space<vmem>>, %arg4: memref<8x128xf32, #tpu.memory_space<vmem>>) attributes {dimension_semantics = [#tpu.dimension_semantics<parallel>], iteration_bounds = array<i64: 1>, scalar_prefetch = 0 : i64, scratch_operands = 0 : i64, tpu.core_type = #tpu.core_type<tc>, window_params = [{transform_indices = @transform_0, window_bounds = array<i64: 8, 32>}, {pipeline_mode = #tpu.pipeline_mode<synchronous>, transform_indices = @transform_1, window_bounds = array<i64: 32, 128>}, {pipeline_mode = #tpu.pipeline_mode<synchronous>, transform_indices = @transform_2, window_bounds = array<i64: 1, 128>}, {transform_indices = @transform_3, window_bounds = array<i64: 8, 128>}]} {
    %c0 = arith.constant 0 : index
    %c0_0 = arith.constant 0 : index
    %0 = vector.load %arg1[%c0, %c0_0] : memref<8x32xf32, #tpu.memory_space<vmem>>, vector<8x32xf32>
    %c0_1 = arith.constant 0 : index
    %c0_2 = arith.constant 0 : index
    %1 = vector.load %arg2[%c0_1, %c0_2] : memref<32x128xf32, #tpu.memory_space<vmem>>, vector<32x128xf32>
    %cst = arith.constant dense<0.000000e+00> : vector<8x128xf32>
    %2 = tpu.matmul %0, %1, %cst {dimension_numbers = #tpu.dot_dimension_numbers<[1], [0], [0], [1], [0, 0, 1, 1], [], []>} : vector<8x32xf32>, vector<32x128xf32>, vector<8x128xf32> -> vector<8x128xf32>
    %c0_3 = arith.constant 0 : index
    %c0_4 = arith.constant 0 : index
    %3 = vector.load %arg3[%c0_3, %c0_4] : memref<1x128xf32, #tpu.memory_space<vmem>>, vector<1x128xf32>
    %4 = vector.broadcast %3 : vector<1x128xf32> to vector<8x128xf32>
    %5 = arith.addf %2, %4 : vector<8x128xf32>
    %c0_5 = arith.constant 0 : index
    %c0_6 = arith.constant 0 : index
    %6 = vector.load %arg4[%c0_5, %c0_6] : memref<8x128xf32, #tpu.memory_space<vmem>>, vector<8x128xf32>
    tpu.vector_store %arg4[%c0_5, %c0_6], %5 {strides = array<i32>} : memref<8x128xf32, #tpu.memory_space<vmem>>, vector<8x128xf32>,
    return
  }
  func.func @transform_0(%arg0: i32) -> (i32, i32) {
    %c0_i32 = arith.constant 0 : i32
    %c0_i32_0 = arith.constant 0 : i32
    return %arg0, %c0_i32 : i32, i32
  }
  func.func @transform_1(%arg0: i32) -> (i32, i32) {
    %c0_i32 = arith.constant 0 : i32
    %c0_i32_0 = arith.constant 0 : i32
    %c0_i32_1 = arith.constant 0 : i32
    return %c0_i32, %c0_i32_0 : i32, i32
  }
  func.func @transform_2(%arg0: i32) -> (i32, i32) {
    %c0_i32 = arith.constant 0 : i32
    %c0_i32_0 = arith.constant 0 : i32
    %c0_i32_1 = arith.constant 0 : i32
    return %c0_i32, %c0_i32_0 : i32, i32
  }
  func.func @transform_3(%arg0: i32) -> (i32, i32) {
    %c0_i32 = arith.constant 0 : i32
    %c0_i32_0 = arith.constant 0 : i32
    return %arg0, %c0_i32 : i32, i32
  }
}

</mosaic_0001>

<bundles_post_ra>
// kernel: gaussian_process_forward.1
= control target key start
LH: loop header
LB: loop body
LE: loop exit
PB: predicated region body
PF: predicated region fallthrough
CT: control target
= control target key end

     0   :  { %8 = vsyncpa [#allocation3], 0  ;;  %s276_s0 = inlined_call_operand.hbm [shape: f32[8,32], index: 0, kind: input, shape index: {}]   ;;  %s277_s1 = inlined_call_operand.hbm [shape: f32[32,128], index: 1, kind: input, shape index: {}]   ;;  %s278_s2 = inlined_call_operand.vmem [shape: f32[1,128], index: 2, kind: input, shape index: {}]   ;;  %s279_s3 = inlined_call_operand.vmem [shape: f32[8,128], index: 3, kind: output, shape index: {}]  }
   0x1   :  { %9 = vsyncpa [#allocation5], 0  ;;  %s212_s12 = smov [#allocation2]   ;;  %s213_s14 = smov [#allocation4]  }
   0x2   :  { %s16_s13 = sshll.u32 %s212_s12, 4  ;;  %s25_s15 = sshll.u32 %s213_s14, 4  ;;  %s17_s13 = int_to_ptr.vmem [resolvable:$true] %s16_s13  ;;  %s239_s15 = int_to_ptr.vmem [resolvable:$true] %s25_s15 }
   0x3   :  { %s164_s18 = scalar_lea.hbm %s276_s0, 128 }
   0x4   :  { %p165_p0 = scmp.ne.s32.totalorder %s276_s0, %s164_s18  ;;  %p168_p1 = scmp.lt.u32.totalorder %s164_s18, %s276_s0 }
   0x6   :  { %p170_p2 = pnand %p168_p1, %p165_p0 }
   0x8   :  { %173 = shalt.err (!%p170_p2)
}
   0x9   :  { %s174_s23 = scalar_lea.vmem %s17_s13, 128  ;;  %p179_p4 = scmp.lt.s32.totalorder %s17_s13, %s17_s13 }
   0xa   :  { %p175_p3 = scmp.ne.s32.totalorder %s17_s13, %s174_s23  ;;  %p180_p5 = scmp.lt.s32.totalorder %s174_s23, %s174_s23 }
   0xc   :  { %p181_p6 = por %p180_p5, %p179_p4 }
   0xe   :  { %p182_p7 = pnand %p181_p6, %p175_p3 }
  0x10   :  { %185 = shalt.err (!%p182_p7)
}
  0x11   :  { %19 = dma.hbm_to_vmem [thread:$0]  %s276_s0, 128, %s17_s13, [#allocation3]  }
  0x12   :  { %s186_s28 = scalar_lea.hbm %s277_s1, 512 }
  0x13   :  { %p187_p8 = scmp.ne.s32.totalorder %s277_s1, %s186_s28  ;;  %p190_p9 = scmp.lt.u32.totalorder %s186_s28, %s277_s1 }
  0x15   :  { %p192_p10 = pnand %p190_p9, %p187_p8 }
  0x17   :  { %195 = shalt.err (!%p192_p10)
}
  0x18   :  { %s196_s6 = scalar_lea.vmem %s239_s15, 512  ;;  %p201_p12 = scmp.lt.s32.totalorder %s239_s15, %s239_s15 }
  0x19   :  { %p197_p11 = scmp.ne.s32.totalorder %s239_s15, %s196_s6  ;;  %p202_p13 = scmp.lt.s32.totalorder %s196_s6, %s196_s6 }
  0x1b   :  { %p203_p0 = por %p202_p13, %p201_p12 }
  0x1d   :  { %p204_p1 = pnand %p203_p0, %p197_p11 }
  0x1f   :  { %207 = shalt.err (!%p204_p1)
}
  0x20   :  { %s214_s0 = smov 128   ;;  %s215_s7 = smov 8  }
  0x21   :  { %31 = dma.hbm_to_vmem [thread:$0]  %s277_s1, 512, %s239_s15, [#allocation5], %s214_s0, %s214_s0, %s215_s7  }
  0x22   :  { %208 = dma.done.wait [#allocation3], 128  }
  0x23   :  { %209 = vsyncadd [#allocation3], 4294967168 }
  0x24   :  { %210 = dma.done.wait [#allocation5], 512  }
  0x25   :  { %211 = vsyncadd [#allocation5], 4294966784  ;;  %v216_v0 = vmov 0.0|0.0   ;;  %vm217_vm0 = vmmov 0   ;;  %v218_v1 = vmov 0.0   ;;  %v41_v2 = vld [vmem:[#allocation4] sm:$0xff] }
  0x26   :  { %151 = vmatprep.subr.bf16.mxu0 %v216_v0  ;;  %148 = vmatprep.mubr.msk.f32.mxu0 %vm217_vm0, %v218_v1  ;;  %v42_v3 = vld [vmem:[#allocation4 + $0x8] sm:$0xff]  ;;  %v43_v4 = vld [vmem:[#allocation4 + $0x10] sm:$0xff]  ;;  %v44_v6 = vld [vmem:[#allocation4 + $0x18] sm:$0xff]  ;;  %vm52_vm1 = vcmask 261120  }
  0x27   :  { %v152_v5 = vpack.c.bf16 %v42_v3, %v41_v2  ;;  %v155_v7 = vpack.c.bf16 %v44_v6, %v43_v4  ;;  %v40_v8 = vld [vmem:[#allocation2] sm:$0xff]  ;;  %v133_v9 = vld [vmem:[%s278_s2] ss:$0 sm:$0xff] }
  0x29   :  { %153 = vmatpush3.bf16.msra.mxu0 %v152_v5 }
  0x2a   :  { %154 = vmatprep.subr.bf16.mxu0 %v216_v0 }
  0x2d   :  { %156 = vmatpush3.bf16.msra.mxu0 %v155_v7 }
  0x30   :  { %149 = vmatmul.mubr.msk.f32.vlgmr.msra.gmra.mrb[0].mxu0 %vm52_vm1, %v40_v8 }
 0x103   :  { %v122_v10 = vpop.f32.mrb[0].mxu0 }
 0x104   :  { %v123_v11 = vadd.f32 %v133_v9, %v122_v10  ;;  %v150_v12 = vpop.f32.mrb[1].mxu0 }
 0x106   :  { %126 = vst [vmem:[%s279_s3] sm:$0xff] %v123_v11 }
 0x107   :  { %131 = vsyncpa [#allocation3], 1 }
 0x108   :  { %132 = vsyncpa [#allocation5], 1 }

</bundles_post_ra>
